<compile_context>
chip_gen: v7x
topology: tpu7x:2x2x1
jax: 0.10.0
libtpu: 0.0.40
codegen_flags: <defaults>
</compile_context>

<pallas_src>
import functools

import jax
import jax.numpy as jnp
import numpy as np
from jax import lax
from jax.experimental import pallas as pl
from jax.experimental.pallas import tpu as pltpu  # noqa: F401  (kept for parity with the TPU kernel toolbox)


def _lstm_recurrence_kernel(gx_ref, h0_ref, c0_ref, whh_ref,
                            out_ref, h_ref, c_ref, *, hidden_size):
    """Single program (no grid).  Everything is VMEM-resident; an in-kernel
    fori_loop runs all T steps.  gx_ref holds the pre-computed input
    projection (with the g-gate lanes pre-scaled by 2)."""
    H = hidden_size
    T = gx_ref.shape[0]

    w_hh = whh_ref[...]                       # (H, 4H) f32 -- loaded once, hoisted out of the loop

    def step(t, carry):
        h_prev, c_prev = carry                # (B, H) f32 value carries
        # Only the h-projection sits on the serial critical path; gx[t] already
        # contains x@W_ih^T + bias (g lanes scaled by 2).
        gates = (jnp.dot(h_prev, w_hh, preferred_element_type=jnp.float32)
                 + gx_ref[t])                 # (B, 4H) lane-dense f32 vreg

        # Single sigmoid pass over the whole (B, 128) tile; the g-gate lanes
        # were pre-scaled by 2, so tanh(z) == 2*sigmoid(2z) - 1 comes out of
        # the same EUP pass (cheap VPU fixup on the g slice).
        sig = jax.nn.sigmoid(gates)
        i_g = sig[:, 0 * H:1 * H]
        f_g = sig[:, 1 * H:2 * H]
        g_g = 2.0 * sig[:, 2 * H:3 * H] - 1.0
        o_g = sig[:, 3 * H:4 * H]

        c_new = f_g * c_prev + i_g * g_g
        h_new = o_g * jnp.tanh(c_new)

        out_ref[t] = h_new                    # store into the resident VMEM output slab
        return h_new, c_new

    h_fin, c_fin = lax.fori_loop(
        0, T, step, (h0_ref[...], c0_ref[...]), unroll=(T <= 16))

    h_ref[...] = h_fin
    c_ref[...] = c_fin


def lstm_sequence_pallas(xs, h0, c0, w_ih_k, w_hh_k, bias_k, *, hidden_size):
    """xs: (T, B, V) f32; h0/c0: (B, H) f32.
    w_ih_k: (V, 4H), w_hh_k: (H, 4H), bias_k: (1, 1, 4H) -- kernel-side params
    (transposed, g-gate columns pre-scaled by 2).

    Returns (outputs (T, B, H), h_T (B, H), c_T (B, H)) -- all f32."""
    T, B, V = xs.shape
    H = hidden_size

    # Hoisted input projection for all T steps: one batched matmul outside the
    # serial recurrence (much better MXU occupancy than T tiny per-step dots).
    # HIGHEST precision: negligible cost at these shapes, keeps fidelity to the
    # f32 nn.LSTM reference.
    gates_x = jnp.dot(xs.astype(jnp.float32), w_ih_k,
                      precision=lax.Precision.HIGHEST,
                      preferred_element_type=jnp.float32) + bias_k     # (T, B, 4H)

    kernel = functools.partial(_lstm_recurrence_kernel, hidden_size=H)
    out_seq, h_last, c_last = pl.pallas_call(
        kernel,
        out_shape=(
            jax.ShapeDtypeStruct((T, B, H), jnp.float32),   # per-step h (resident slab)
            jax.ShapeDtypeStruct((B, H), jnp.float32),      # final h
            jax.ShapeDtypeStruct((B, H), jnp.float32),      # final c
        ),
        # No grid / default BlockSpecs: every operand and output is a single
        # whole-array VMEM-resident block; the recurrence runs as an in-kernel
        # fori_loop and the output slab is written back to HBM exactly once.
    )(gates_x, h0.astype(jnp.float32), c0.astype(jnp.float32), w_hh_k)
    return out_seq, h_last, c_last


class LSTMControllerPallas:
    """Mirrors ntm/controller.py::LSTMController (single-layer LSTM)."""

    def __init__(self, vector_length, hidden_size, key):
        self.vector_length = vector_length
        self.hidden_size = hidden_size
        H, V = hidden_size, vector_length
        k0, k1, k2, k3 = jax.random.split(key, 4)

        stdev = 5.0 / np.sqrt(V + H)
        # PyTorch nn.LSTM params (f32): weight_ih_l0 (4H, V), weight_hh_l0 (4H, H);
        # both bias vectors are zero-initialized by the module's init loop.
        self.w_ih = jax.random.uniform(k0, (4 * H, V), jnp.float32, -stdev, stdev)
        self.w_hh = jax.random.uniform(k1, (4 * H, H), jnp.float32, -stdev, stdev)
        self.bias = jnp.zeros((4 * H,), jnp.float32)   # b_ih + b_hh

        # Kernel-side parameters: transposed, with the g-gate columns scaled by
        # 2 (exact power-of-two) so tanh folds into the single in-kernel
        # sigmoid pass via tanh(z) = 2*sigmoid(2z) - 1.
        gate_scale = jnp.ones((4 * H,), jnp.float32).at[2 * H:3 * H].set(2.0)
        self.w_ih_k = self.w_ih.T * gate_scale[None, :]               # (V, 4H)
        self.w_hh_k = self.w_hh.T * gate_scale[None, :]               # (H, 4H)
        self.bias_k = (self.bias * gate_scale).reshape(1, 1, 4 * H)   # (1, 1, 4H)

        # Learned initial-state parameters: randn(1, 1, H) * 0.05
        self.lstm_h_state = jax.random.normal(k2, (1, 1, H)) * 0.05
        self.lstm_c_state = jax.random.normal(k3, (1, 1, H)) * 0.05

    def get_initial_state(self, batch_size):
        h = jnp.tile(self.lstm_h_state, (1, batch_size, 1))
        c = jnp.tile(self.lstm_c_state, (1, batch_size, 1))
        return (h, c)

    def forward(self, x, state):
        """x: (B, V); state: ((1,B,H), (1,B,H)) -- exactly the module contract."""
        h, c = state
        out_seq, h_new, c_new = lstm_sequence_pallas(
            x[None].astype(jnp.float32), h[0], c[0],
            self.w_ih_k, self.w_hh_k, self.bias_k, hidden_size=self.hidden_size)
        return out_seq[0], (h_new[None, ...], c_new[None, ...])

    def forward_sequence(self, xs, state):
        """Fused multi-timestep path: xs (T, B, V) -> ((T, B, H), new state)."""
        h, c = state
        out_seq, h_new, c_new = lstm_sequence_pallas(
            xs.astype(jnp.float32), h[0], c[0],
            self.w_ih_k, self.w_hh_k, self.bias_k, hidden_size=self.hidden_size)
        return out_seq, (h_new[None, ...], c_new[None, ...])


def _reference_sequence(ctrl, xs, state):
    """Faithful f32 LSTM reference (standard tanh, unscaled f32 weights)."""
    h, c = state[0][0], state[1][0]
    H = ctrl.hidden_size
    w_ih_t, w_hh_t, b = ctrl.w_ih.T, ctrl.w_hh.T, ctrl.bias
    hp = lax.Precision.HIGHEST
    outs = []
    for t in range(xs.shape[0]):
        gates = (jnp.dot(xs[t], w_ih_t, precision=hp)
                 + jnp.dot(h, w_hh_t, precision=hp) + b)
        i = jax.nn.sigmoid(gates[:, :H])
        f = jax.nn.sigmoid(gates[:, H:2 * H])
        g = jnp.tanh(gates[:, 2 * H:3 * H])
        o = jax.nn.sigmoid(gates[:, 3 * H:])
        c = f * c + i * g
        h = o * jnp.tanh(c)
        outs.append(h)
    return jnp.stack(outs), (h[None], c[None])


if __name__ == "__main__":
    key = jax.random.PRNGKey(0)
    k_param, k_x = jax.random.split(key)

    batch = 8            # fills the 8-sublane tile
    vector_length = 8
    hidden_size = 32
    seq_len = 8

    ctrl = LSTMControllerPallas(vector_length, hidden_size, k_param)

    xs = jax.random.normal(k_x, (seq_len, batch, vector_length), jnp.float32)
    state0 = ctrl.get_initial_state(batch)

    # Single-step forward (exact module contract, seq_len == 1).
    out1, (h1, c1) = ctrl.forward(xs[0], state0)
    jax.block_until_ready((out1, h1, c1))
    assert out1.shape == (batch, hidden_size)
    assert h1.shape == (1, batch, hidden_size)
    assert c1.shape == (1, batch, hidden_size)

    # Fused full-sequence forward: ONE pallas_call, in-kernel loop over T.
    out_seq, (hT, cT) = ctrl.forward_sequence(xs, state0)
    jax.block_until_ready((out_seq, hT, cT))
    assert out_seq.shape == (seq_len, batch, hidden_size)

    ref_seq, (ref_h, ref_c) = _reference_sequence(ctrl, xs, state0)
    # Tolerance covers TPU default-precision differences between the in-kernel
    # f32 MXU dot and the HIGHEST-precision XLA reference dots (typically the
    # match is far tighter).
    TOL = dict(rtol=5e-3, atol=5e-3)
    np.testing.assert_allclose(np.asarray(out1), np.asarray(ref_seq[0]), **TOL)
    np.testing.assert_allclose(np.asarray(out_seq), np.asarray(ref_seq), **TOL)
    np.testing.assert_allclose(np.asarray(hT), np.asarray(ref_h), **TOL)
    np.testing.assert_allclose(np.asarray(cT), np.asarray(ref_c), **TOL)

    print("KERNEL_OK")
</pallas_src>

<mosaic_0001>
module attributes {stable_mosaic.version = 11 : i64} {
  func.func @_lstm_recurrence_kernel(%arg0: memref<1x8x128xf32, #tpu.memory_space<vmem>>, %arg1: memref<8x32xf32, #tpu.memory_space<vmem>>, %arg2: memref<8x32xf32, #tpu.memory_space<vmem>>, %arg3: memref<32x128xf32, #tpu.memory_space<vmem>>, %arg4: memref<1x8x32xf32, #tpu.memory_space<vmem>>, %arg5: memref<8x32xf32, #tpu.memory_space<vmem>>, %arg6: memref<8x32xf32, #tpu.memory_space<vmem>>) attributes {dimension_semantics = [], scalar_prefetch = 0 : i64, scratch_operands = 0 : i64, tpu.core_type = #tpu.core_type<tc>} {
    %c0 = arith.constant 0 : index
    %c0_0 = arith.constant 0 : index
    %0 = vector.load %arg3[%c0, %c0_0] : memref<32x128xf32, #tpu.memory_space<vmem>>, vector<32x128xf32>
    %c0_1 = arith.constant 0 : index
    %c0_2 = arith.constant 0 : index
    %1 = vector.load %arg1[%c0_1, %c0_2] : memref<8x32xf32, #tpu.memory_space<vmem>>, vector<8x32xf32>
    %c0_3 = arith.constant 0 : index
    %c0_4 = arith.constant 0 : index
    %2 = vector.load %arg2[%c0_3, %c0_4] : memref<8x32xf32, #tpu.memory_space<vmem>>, vector<8x32xf32>
    %c0_i32 = arith.constant 0 : i32
    %cst = arith.constant dense<0.000000e+00> : vector<8x128xf32>
    %3 = tpu.matmul %1, %0, %cst {dimension_numbers = #tpu.dot_dimension_numbers<[1], [0], [0], [1], [0, 0, 1, 1], [], []>} : vector<8x32xf32>, vector<32x128xf32>, vector<8x128xf32> -> vector<8x128xf32>
    %4 = arith.index_cast %c0_i32 : i32 to index
    %c0_5 = arith.constant 0 : index
    %c0_6 = arith.constant 0 : index
    %5 = vector.load %arg0[%4, %c0_5, %c0_6] : memref<1x8x128xf32, #tpu.memory_space<vmem>>, vector<1x8x128xf32>
    %6 = vector.shape_cast %5 : vector<1x8x128xf32> to vector<8x128xf32>
    %7 = arith.addf %3, %6 : vector<8x128xf32>
    %8 = arith.negf %7 : vector<8x128xf32>
    %9 = math.exp %8 : vector<8x128xf32>
    %cst_7 = arith.constant 1.000000e+00 : f32
    %10 = vector.broadcast %cst_7 : f32 to vector<8x128xf32>
    %11 = arith.addf %10, %9 : vector<8x128xf32>
    %12 = arith.divf %10, %11 : vector<8x128xf32>
    %13 = vector.extract_strided_slice %12 {offsets = [0, 0], sizes = [8, 32], strides = [1, 1]} : vector<8x128xf32> to vector<8x32xf32>
    %14 = vector.extract_strided_slice %12 {offsets = [0, 32], sizes = [8, 32], strides = [1, 1]} : vector<8x128xf32> to vector<8x32xf32>
    %15 = vector.extract_strided_slice %12 {offsets = [0, 64], sizes = [8, 32], strides = [1, 1]} : vector<8x128xf32> to vector<8x32xf32>
    %cst_8 = arith.constant 2.000000e+00 : f32
    %16 = vector.broadcast %cst_8 : f32 to vector<8x32xf32>
    %17 = arith.mulf %16, %15 : vector<8x32xf32>
    %cst_9 = arith.constant 1.000000e+00 : f32
    %18 = vector.broadcast %cst_9 : f32 to vector<8x32xf32>
    %19 = arith.subf %17, %18 : vector<8x32xf32>
    %20 = vector.extract_strided_slice %12 {offsets = [0, 96], sizes = [8, 32], strides = [1, 1]} : vector<8x128xf32> to vector<8x32xf32>
    %21 = arith.mulf %14, %2 : vector<8x32xf32>
    %22 = arith.mulf %13, %19 : vector<8x32xf32>
    %23 = arith.addf %21, %22 : vector<8x32xf32>
    %24 = math.tanh %23 : vector<8x32xf32>
    %25 = arith.mulf %20, %24 : vector<8x32xf32>
    %26 = arith.index_cast %c0_i32 : i32 to index
    %c0_10 = arith.constant 0 : index
    %c0_11 = arith.constant 0 : index
    %27 = vector.load %arg4[%26, %c0_10, %c0_11] : memref<1x8x32xf32, #tpu.memory_space<vmem>>, vector<1x8x32xf32>
    %28 = vector.shape_cast %27 : vector<1x8x32xf32> to vector<8x32xf32>
    %29 = vector.shape_cast %25 : vector<8x32xf32> to vector<1x8x32xf32>
    tpu.vector_store %arg4[%26, %c0_10, %c0_11], %29 {strides = array<i32>} : memref<1x8x32xf32, #tpu.memory_space<vmem>>, vector<1x8x32xf32>,
    %c1_i32 = arith.constant 1 : i32
    %c0_12 = arith.constant 0 : index
    %c0_13 = arith.constant 0 : index
    %30 = vector.load %arg5[%c0_12, %c0_13] : memref<8x32xf32, #tpu.memory_space<vmem>>, vector<8x32xf32>
    tpu.vector_store %arg5[%c0_12, %c0_13], %25 {strides = array<i32>} : memref<8x32xf32, #tpu.memory_space<vmem>>, vector<8x32xf32>,
    %c0_14 = arith.constant 0 : index
    %c0_15 = arith.constant 0 : index
    %31 = vector.load %arg6[%c0_14, %c0_15] : memref<8x32xf32, #tpu.memory_space<vmem>>, vector<8x32xf32>
    tpu.vector_store %arg6[%c0_14, %c0_15], %23 {strides = array<i32>} : memref<8x32xf32, #tpu.memory_space<vmem>>, vector<8x32xf32>,
    return
  }
}

</mosaic_0001>

<bundles_post_ra>
// kernel: tpu_custom_call.1
= control target key start
LH: loop header
LB: loop body
LE: loop exit
PB: predicated region body
PF: predicated region fallthrough
CT: control target
= control target key end

     0   :  { %12 = vsyncpa [#allocation3], 0  ;;  %s605_s0 = inlined_call_operand.hbm [shape: f32[1,8,128], index: 0, kind: input, shape index: {}]   ;;  %s606_s1 = inlined_call_operand.hbm [shape: f32[8,32], index: 1, kind: input, shape index: {}]   ;;  %s607_s2 = inlined_call_operand.hbm [shape: f32[8,32], index: 2, kind: input, shape index: {}]   ;;  %s608_s3 = inlined_call_operand.hbm [shape: f32[32,128], index: 3, kind: input, shape index: {}]   ;;  %s609_s4 = inlined_call_operand.hbm [shape: f32[1,8,32], index: 4, kind: output, shape index: {0}]   ;;  %s610_s5 = inlined_call_operand.hbm [shape: f32[8,32], index: 5, kind: output, shape index: {1}]   ;;  %s611_s6 = inlined_call_operand.hbm [shape: f32[8,32], index: 6, kind: output, shape index: {2}]  }
   0x1   :  { %13 = vsyncpa [#allocation6], 0 }
   0x2   :  { %14 = vsyncpa [#allocation9], 0 }
   0x3   :  { %15 = vsyncpa [#allocation4], 0 }
   0x4   :  { %16 = vsyncpa [#allocation12], 0  ;;  %s446_s21 = smov [#allocation5]   ;;  %s447_s23 = smov [#allocation2]  }
   0x5   :  { %s33_s22 = sshll.u32 %s446_s21, 4  ;;  %s23_s24 = sshll.u32 %s447_s23, 4  ;;  %s34_s22 = int_to_ptr.vmem [resolvable:$true] %s33_s22  ;;  %s24_s24 = int_to_ptr.vmem [resolvable:$true] %s23_s24 }
   0x6   :  { %s282_s27 = scalar_lea.hbm %s606_s1, 128 }
   0x7   :  { %p283_p0 = scmp.ne.s32.totalorder %s606_s1, %s282_s27  ;;  %p286_p1 = scmp.lt.u32.totalorder %s282_s27, %s606_s1 }
   0x9   :  { %p288_p2 = pnand %p286_p1, %p283_p0 }
   0xb   :  { %291 = shalt.err (!%p288_p2)
}
   0xc   :  { %s292_s8 = scalar_lea.vmem %s34_s22, 128  ;;  %p297_p4 = scmp.lt.s32.totalorder %s34_s22, %s34_s22 }
   0xd   :  { %p293_p3 = scmp.ne.s32.totalorder %s34_s22, %s292_s8  ;;  %p298_p5 = scmp.lt.s32.totalorder %s292_s8, %s292_s8 }
   0xf   :  { %p299_p6 = por %p298_p5, %p297_p4 }
  0x11   :  { %p300_p7 = pnand %p299_p6, %p293_p3 }
  0x13   :  { %303 = shalt.err (!%p300_p7)
}
  0x14   :  { %36 = dma.hbm_to_vmem [thread:$0]  %s606_s1, 128, %s34_s22, [#allocation6]  }
  0x15   :  { %s304_s13 = scalar_lea.hbm %s605_s0, 128 }
  0x16   :  { %p305_p8 = scmp.ne.s32.totalorder %s605_s0, %s304_s13  ;;  %p308_p9 = scmp.lt.u32.totalorder %s304_s13, %s605_s0 }
  0x18   :  { %p310_p10 = pnand %p308_p9, %p305_p8 }
  0x1a   :  { %313 = shalt.err (!%p310_p10)
}
  0x1b   :  { %s314_s18 = scalar_lea.vmem %s24_s24, 128  ;;  %p319_p12 = scmp.lt.s32.totalorder %s24_s24, %s24_s24 }
  0x1c   :  { %p315_p11 = scmp.ne.s32.totalorder %s24_s24, %s314_s18  ;;  %p320_p13 = scmp.lt.s32.totalorder %s314_s18, %s314_s18 }
  0x1e   :  { %p321_p0 = por %p320_p13, %p319_p12 }
  0x20   :  { %p322_p1 = pnand %p321_p0, %p315_p11 }
  0x22   :  { %325 = shalt.err (!%p322_p1)
}
  0x23   :  { %26 = dma.hbm_to_vmem [thread:$0]  %s605_s0, 128, %s24_s24, [#allocation3]  }
  0x24   :  { %s448_s20 = smov [#allocation7]   ;;  %s449_s22 = smov [#allocation8]  }
  0x25   :  { %s43_s21 = sshll.u32 %s448_s20, 4  ;;  %s52_s23 = sshll.u32 %s449_s22, 4  ;;  %s44_s21 = int_to_ptr.vmem [resolvable:$true] %s43_s21  ;;  %s520_s23 = int_to_ptr.vmem [resolvable:$true] %s52_s23 }
  0x26   :  { %s326_s27 = scalar_lea.hbm %s607_s2, 128 }
  0x27   :  { %p327_p2 = scmp.ne.s32.totalorder %s607_s2, %s326_s27  ;;  %p330_p3 = scmp.lt.u32.totalorder %s326_s27, %s607_s2 }
  0x29   :  { %p332_p4 = pnand %p330_p3, %p327_p2 }
  0x2b   :  { %335 = shalt.err (!%p332_p4)
}
  0x2c   :  { %s336_s0 = scalar_lea.vmem %s44_s21, 128  ;;  %p341_p6 = scmp.lt.s32.totalorder %s44_s21, %s44_s21 }
  0x2d   :  { %p337_p5 = scmp.ne.s32.totalorder %s44_s21, %s336_s0  ;;  %p342_p7 = scmp.lt.s32.totalorder %s336_s0, %s336_s0 }
  0x2f   :  { %p343_p8 = por %p342_p7, %p341_p6 }
  0x31   :  { %p344_p9 = pnand %p343_p8, %p337_p5 }
  0x33   :  { %347 = shalt.err (!%p344_p9)
}
  0x34   :  { %46 = dma.hbm_to_vmem [thread:$0]  %s607_s2, 128, %s44_s21, [#allocation6]  }
  0x35   :  { %s348_s11 = scalar_lea.hbm %s608_s3, 512 }
  0x36   :  { %p349_p10 = scmp.ne.s32.totalorder %s608_s3, %s348_s11  ;;  %p352_p11 = scmp.lt.u32.totalorder %s348_s11, %s608_s3 }
  0x38   :  { %p354_p12 = pnand %p352_p11, %p349_p10 }
  0x3a   :  { %357 = shalt.err (!%p354_p12)
}
  0x3b   :  { %s358_s16 = scalar_lea.vmem %s520_s23, 512  ;;  %p363_p0 = scmp.lt.s32.totalorder %s520_s23, %s520_s23 }
  0x3c   :  { %p359_p13 = scmp.ne.s32.totalorder %s520_s23, %s358_s16  ;;  %p364_p1 = scmp.lt.s32.totalorder %s358_s16, %s358_s16 }
  0x3e   :  { %p365_p2 = por %p364_p1, %p363_p0 }
  0x40   :  { %p366_p3 = pnand %p365_p2, %p359_p13 }
  0x42   :  { %369 = shalt.err (!%p366_p3)
}
  0x43   :  { %s450_s2 = smov 128   ;;  %s451_s17 = smov 8  }
  0x44   :  { %58 = dma.hbm_to_vmem [thread:$0]  %s608_s3, 512, %s520_s23, [#allocation9], %s450_s2, %s450_s2, %s451_s17  }
  0x45   :  { %436 = dma.done.wait [#allocation3], 128  }
  0x46   :  { %437 = vsyncadd [#allocation3], 4294967168 }
  0x47   :  { %438 = dma.done.wait [#allocation6], 256  }
  0x48   :  { %439 = vsyncadd [#allocation6], 4294967040 }
  0x49   :  { %440 = dma.done.wait [#allocation9], 512  }
  0x4a   :  { %441 = vsyncadd [#allocation9], 4294966784  ;;  %v452_v0 = vmov 0.0|0.0   ;;  %vm453_vm0 = vmmov 0   ;;  %v454_v1 = vmov 0.0   ;;  %v71_v2 = vld [vmem:[#allocation8] sm:$0xff] }
  0x4b   :  { %255 = vmatprep.subr.bf16.mxu0 %v452_v0  ;;  %252 = vmatprep.mubr.msk.f32.mxu0 %vm453_vm0, %v454_v1  ;;  %v72_v3 = vld [vmem:[#allocation8 + $0x8] sm:$0xff]  ;;  %v73_v4 = vld [vmem:[#allocation8 + $0x10] sm:$0xff]  ;;  %v74_v6 = vld [vmem:[#allocation8 + $0x18] sm:$0xff]  ;;  %vm78_vm1 = vcmask 261120   ;;  %s455_s3 = smov 64   ;;  %s456_s19 = smov 32  }
  0x4c   :  { %v256_v5 = vpack.c.bf16 %v72_v3, %v71_v2  ;;  %v259_v7 = vpack.c.bf16 %v74_v6, %v73_v4  ;;  %v75_v8 = vld [vmem:[#allocation5] sm:$0xff]  ;;  %v77_v9 = vld [vmem:[#allocation2] sm:$0xff]  ;;  %v76_v19 = vld [vmem:[#allocation7] sm:$0xff]  ;;  %s457_s20 = smov 96   ;;  %s458_s21 = smov [#allocation11]  }
  0x4d   :  { %s208_s22 = sshll.u32 %s458_s21, 4  ;;  %s459_s23 = smov [#allocation10]   ;;  %s209_s22 = int_to_ptr.vmem [resolvable:$true] %s208_s22 }
  0x4e   :  { %257 = vmatpush3.bf16.msra.mxu0 %v256_v5  ;;  %s198_s25 = sshll.u32 %s459_s23, 4  ;;  %s460_s26 = smov [#allocation13]   ;;  %s553_s25 = int_to_ptr.vmem [resolvable:$true] %s198_s25 }
  0x4f   :  { %258 = vmatprep.subr.bf16.mxu0 %v452_v0  ;;  %s218_s27 = sshll.u32 %s460_s26, 4  ;;  %s370_s28 = scalar_lea.vmem %s209_s22, 128  ;;  %s557_s27 = int_to_ptr.vmem [resolvable:$true] %s218_s27 }
  0x50   :  { %p371_p4 = scmp.ne.s32.totalorder %s209_s22, %s370_s28  ;;  %p375_p5 = scmp.lt.s32.totalorder %s209_s22, %s209_s22 }
  0x51   :  { %p376_p6 = scmp.lt.s32.totalorder %s370_s28, %s370_s28 }
  0x52   :  { %260 = vmatpush3.bf16.msra.mxu0 %v259_v7 }
  0x53   :  { %p377_p7 = por %p376_p6, %p375_p5 }
  0x55   :  { %253 = vmatmul.mubr.msk.f32.vlgmr.msra.gmra.mrb[0].mxu0 %vm78_vm1, %v75_v8  ;;  %p378_p8 = pnand %p377_p7, %p371_p4 }
 0x128   :  { %v148_v10 = vpop.f32.mrb[0].mxu0 }
 0x129   :  { %v149_v11 = vadd.f32 %v148_v10, %v77_v9  ;;  %v254_v12 = vpop.f32.mrb[1].mxu0 }
 0x12b   :  { %v237_v13 = vmul.f32 -1.442695, %v149_v11 }
 0x12d   :  { %276 = vpow2.f32 %v237_v13 }
 0x137   :  { %v277_v14 = vpop.eup %276 }
 0x138   :  { %v155_v15 = vadd.f32 1.0, %v277_v14 }
 0x13a   :  { %278 = vrcp.f32 %v155_v15 }
 0x144   :  { %v279_v16 = vpop.eup %278 }
 0x145   :  { %v158_v17 = vmul.f32 2.0, %v279_v16 }
 0x147   :  { %v238_v18 = vadd.f32 -1.0, %v158_v17 }
 0x149   :  { %166 = vrot.lane.b32.xlu0 %v238_v18, %s455_s3 }
 0x14d   :  { %161 = vrot.lane.b32.xlu0 %v76_v19, %s456_s19 }
 0x1bb   :  { %v167_v20 = vpop.permute.xlu0 %166 }
 0x1bc   :  { %v169_v21 = vmul.f32 %v279_v16, %v167_v20 }
 0x1be   :  { %171 = vrot.lane.b32.xlu1 %v169_v21, %s456_s19 }
 0x1bf   :  { %v162_v22 = vpop.permute.xlu0 %161 }
 0x1c0   :  { %v164_v23 = vmul.f32 %v279_v16, %v162_v22 }
 0x230   :  { %v172_v24 = vpop.permute.xlu1 %171 }
 0x231   :  { %v174_v25 = vadd.f32 %v172_v24, %v164_v23 }
 0x233   :  { %280 = vtanh.f32 %v174_v25 }
 0x23d   :  { %v281_v26 = vpop.eup %280 }
 0x23e   :  { %177 = vrot.lane.b32.xlu1 %v281_v26, %s455_s3 }
 0x242   :  { %188 = vrot.lane.b32.xlu1 %v174_v25, %s457_s20 }
 0x2b0   :  { %v178_v27 = vpop.permute.xlu1 %177 }
 0x2b1   :  { %v180_v28 = vmul.f32 %v279_v16, %v178_v27 }
 0x2b3   :  { %182 = vrot.lane.b32.xlu0 %v180_v28, %s456_s19 }
 0x2b4   :  { %v189_v29 = vpop.permute.xlu1 %188 }
 0x2b5   :  { %191 = vst.msk [vmem:[#allocation13] sm:$0xff] %vm78_vm1, %v189_v29 }
 0x325   :  { %v183_v30 = vpop.permute.xlu0 %182 }
 0x326   :  { %185 = vst.msk [vmem:[#allocation10] sm:$0xff] %vm78_vm1, %v183_v30  ;;  %186 = vst.msk [vmem:[#allocation11] sm:$0xff] %vm78_vm1, %v183_v30 }
 0x327   :  { %381 = shalt.err (!%p378_p8)
}
 0x328   :  { %s382_s7 = scalar_lea.hbm %s610_s5, 128 }
 0x329   :  { %p383_p9 = scmp.ne.s32.totalorder %s610_s5, %s382_s7  ;;  %p386_p10 = scmp.lt.u32.totalorder %s382_s7, %s610_s5 }
 0x32b   :  { %p388_p11 = pnand %p386_p10, %p383_p9 }
 0x32d   :  { %391 = shalt.err (!%p388_p11)
}
 0x32e   :  { %211 = dma.vmem_to_hbm [thread:$0]  %s209_s22, 128, %s610_s5, [#allocation12]  }
 0x32f   :  { %s392_s12 = scalar_lea.vmem %s553_s25, 128  ;;  %p397_p13 = scmp.lt.s32.totalorder %s553_s25, %s553_s25 }
 0x330   :  { %p393_p12 = scmp.ne.s32.totalorder %s553_s25, %s392_s12  ;;  %p398_p0 = scmp.lt.s32.totalorder %s392_s12, %s392_s12 }
 0x332   :  { %p399_p1 = por %p398_p0, %p397_p13 }
 0x334   :  { %p400_p2 = pnand %p399_p1, %p393_p12 }
 0x336   :  { %403 = shalt.err (!%p400_p2)
}
 0x337   :  { %s404_s15 = scalar_lea.hbm %s609_s4, 128 }
 0x338   :  { %p405_p3 = scmp.ne.s32.totalorder %s609_s4, %s404_s15  ;;  %p408_p4 = scmp.lt.u32.totalorder %s404_s15, %s609_s4 }
 0x33a   :  { %p410_p5 = pnand %p408_p4, %p405_p3 }
 0x33c   :  { %413 = shalt.err (!%p410_p5)
}
 0x33d   :  { %201 = dma.vmem_to_hbm [thread:$0]  %s553_s25, 128, %s609_s4, [#allocation4]  }
 0x33e   :  { %s414_s3 = scalar_lea.vmem %s557_s27, 128  ;;  %p419_p7 = scmp.lt.s32.totalorder %s557_s27, %s557_s27 }
 0x33f   :  { %p415_p6 = scmp.ne.s32.totalorder %s557_s27, %s414_s3  ;;  %p420_p8 = scmp.lt.s32.totalorder %s414_s3, %s414_s3 }
 0x341   :  { %p421_p9 = por %p420_p8, %p419_p7 }
 0x343   :  { %p422_p10 = pnand %p421_p9, %p415_p6 }
 0x345   :  { %425 = shalt.err (!%p422_p10)
}
 0x346   :  { %s426_s21 = scalar_lea.hbm %s611_s6, 128 }
 0x347   :  { %p427_p11 = scmp.ne.s32.totalorder %s611_s6, %s426_s21  ;;  %p430_p12 = scmp.lt.u32.totalorder %s426_s21, %s611_s6 }
 0x349   :  { %p432_p13 = pnand %p430_p12, %p427_p11 }
 0x34b   :  { %435 = shalt.err (!%p432_p13)
}
 0x34c   :  { %221 = dma.vmem_to_hbm [thread:$0]  %s557_s27, 128, %s611_s6, [#allocation12]  }
 0x34d   :  { %442 = dma.done.wait [#allocation4], 128  }
 0x34e   :  { %443 = vsyncadd [#allocation4], 4294967168 }
 0x34f   :  { %444 = dma.done.wait [#allocation12], 256  }
 0x350   :  { %445 = vsyncadd [#allocation12], 4294967040 }
 0x351   :  { %231 = vsyncpa [#allocation3], 1 }
 0x352   :  { %232 = vsyncpa [#allocation6], 1 }
 0x353   :  { %233 = vsyncpa [#allocation9], 1 }
 0x354   :  { %234 = vsyncpa [#allocation4], 1 }
 0x355   :  { %235 = vsyncpa [#allocation12], 1 }

</bundles_post_ra>
